<compile_context>
chip_gen: v6e
topology: v6e:2x2x1
jax: 0.10.0
libtpu: 0.0.40
codegen_flags: <defaults>
</compile_context>

<pallas_src>
import jax
import jax.numpy as jnp
from jax.experimental import pallas as pl
from jax.experimental.pallas import tpu as pltpu

# ---------------- model dimensions (small, consistent with the module) ----------------
BATCH       = 16
ITEM_NUM    = 4
ITEM_SIZE   = 8
N_EMBEDDING = 16
N_HIDDEN    = 32
N_OUTPUT    = 10
N_MLP_INPUT = ITEM_NUM * N_EMBEDDING            # 64
N_IN_FLAT   = ITEM_NUM * ITEM_SIZE              # 32

LANES = 128                                     # lane-dense width for every matmul

# ---- packed-slab row layout (all offsets multiples of 8 => sublane-aligned) ----
W_BD_OFF = 0                                    # (32, 128)  block-diag item embedding
W1_OFF   = 32                                   # (128, 128) MLP layer 1
W2_OFF   = 160                                  # (128, 128) MLP layer 2
W3_OFF   = 288                                  # (128, 128) MLP layer 3
B_BD_ROW = 416                                  # (1, 128) biases, each in its own
B1_ROW   = 424                                  #          8-row band so every read
B2_ROW   = 432                                  #          starts sublane-aligned
B3_ROW   = 440
SLAB_ROWS = 448                                 # (448, 128) f32 = 224 KiB


# ---------------- fused Pallas kernel ----------------
def _simulator_kernel(x_ref, slab_ref, o_ref):
    # x: (B, item_num*item_size); slab: packed, zero-padded weights/biases.
    # Padded lanes stay exactly zero through tanh/relu, so no masking is needed.
    x = x_ref[...]

    w_bd = slab_ref[W_BD_OFF:W_BD_OFF + 32, :]          # (32, 128)
    w1   = slab_ref[W1_OFF:W1_OFF + 128, :]             # (128, 128)
    w2   = slab_ref[W2_OFF:W2_OFF + 128, :]             # (128, 128)
    w3   = slab_ref[W3_OFF:W3_OFF + 128, :]             # (128, 128)
    b_bd = slab_ref[B_BD_ROW:B_BD_ROW + 1, :]           # (1, 128)
    b1   = slab_ref[B1_ROW:B1_ROW + 1, :]
    b2   = slab_ref[B2_ROW:B2_ROW + 1, :]
    b3   = slab_ref[B3_ROW:B3_ROW + 1, :]

    h = jnp.tanh(jnp.dot(x, w_bd, preferred_element_type=jnp.float32) + b_bd)
    h = jnp.maximum(jnp.dot(h, w1, preferred_element_type=jnp.float32) + b1, 0.0)
    h = jnp.maximum(jnp.dot(h, w2, preferred_element_type=jnp.float32) + b2, 0.0)
    o_ref[...] = jnp.dot(h, w3, preferred_element_type=jnp.float32) + b3


# ---------------- one-time parameter packing (NOT in the per-call path) ----------------
def _pad_block(a, rows, cols=LANES):
    out = jnp.zeros((rows, cols), jnp.float32)
    return out.at[: a.shape[0], : a.shape[1]].set(a.astype(jnp.float32))


def pack_params(p):
    """Fold the per-item embedding Linear into a block-diagonal matmul and pack
    all weights/biases (zero-padded to 128 lanes) into one contiguous slab."""
    w_bd = jnp.kron(jnp.eye(ITEM_NUM, dtype=jnp.float32), p["we"])   # (32, 64)
    b_bd = jnp.tile(p["be"], (1, ITEM_NUM))                          # (1, 64)
    slab = jnp.concatenate(
        [
            _pad_block(w_bd, 32),          # rows   0..31
            _pad_block(p["w1"], 128),      # rows  32..159
            _pad_block(p["w2"], 128),      # rows 160..287
            _pad_block(p["w3"], 128),      # rows 288..415
            _pad_block(b_bd, 8),           # rows 416..423 (row 416 used)
            _pad_block(p["b1"], 8),        # rows 424..431
            _pad_block(p["b2"], 8),        # rows 432..439
            _pad_block(p["b3"], 8),        # rows 440..447
        ],
        axis=0,
    )
    assert slab.shape == (SLAB_ROWS, LANES)
    return slab


# ---------------- jitted wrapper ----------------
@jax.jit
def simulator_forward(current, slab):
    """current: (B, item_num*item_size) f32, slab: packed params -> (B, n_output)."""
    B = current.shape[0]
    flops = 2 * B * (N_IN_FLAT * N_MLP_INPUT
                     + N_MLP_INPUT * 2 * N_HIDDEN
                     + 2 * N_HIDDEN * N_HIDDEN
                     + N_HIDDEN * N_OUTPUT)
    bytes_accessed = 4 * (current.size + SLAB_ROWS * LANES + B * LANES)

    out_pad = pl.pallas_call(
        _simulator_kernel,
        out_shape=jax.ShapeDtypeStruct((B, LANES), jnp.float32),
        in_specs=[
            pl.BlockSpec(memory_space=pltpu.MemorySpace.VMEM),
            pl.BlockSpec(memory_space=pltpu.MemorySpace.VMEM),
        ],
        out_specs=pl.BlockSpec(memory_space=pltpu.MemorySpace.VMEM),
        cost_estimate=pl.CostEstimate(
            flops=flops,
            transcendentals=B * N_MLP_INPUT,     # tanh on the embedding
            bytes_accessed=bytes_accessed,
        ),
    )(current, slab)
    return out_pad[:, :N_OUTPUT]


# ---------------- deterministic parameter init (PyTorch-Linear-style uniform) ----------------
def _init_linear(key, fan_in, fan_out):
    kw, kb = jax.random.split(key)
    bound = 1.0 / jnp.sqrt(jnp.float32(fan_in))
    w = jax.random.uniform(kw, (fan_in, fan_out), jnp.float32, -bound, bound)
    b = jax.random.uniform(kb, (1, fan_out), jnp.float32, -bound, bound)
    return w, b


def make_params(key):
    k0, k1, k2, k3 = jax.random.split(key, 4)
    we, be = _init_linear(k0, ITEM_SIZE, N_EMBEDDING)                 # item_embedding Linear
    w1, b1 = _init_linear(k1, N_MLP_INPUT, 2 * N_HIDDEN)              # MLP layer 1
    w2, b2 = _init_linear(k2, 2 * N_HIDDEN, N_HIDDEN)                 # MLP layer 2
    w3, b3 = _init_linear(k3, N_HIDDEN, N_OUTPUT)                     # MLP layer 3
    return dict(we=we, be=be, w1=w1, b1=b1, w2=w2, b2=b2, w3=w3, b3=b3)


# ---------------- pure-JAX reference (mirrors the PyTorch forward) ----------------
def reference_forward(current, p):
    B = current.shape[0]
    x = current.reshape(B, ITEM_NUM, ITEM_SIZE)
    emb = jnp.tanh(x @ p["we"] + p["be"][0])                          # item_embedding + Tanh
    h = emb.reshape(B, -1)
    h = jnp.maximum(h @ p["w1"] + p["b1"][0], 0.0)                    # Dropout = identity
    h = jnp.maximum(h @ p["w2"] + p["b2"][0], 0.0)
    return h @ p["w3"] + p["b3"][0]


if __name__ == "__main__":
    key = jax.random.PRNGKey(0)
    k_param, k_in = jax.random.split(key)
    params = make_params(k_param)
    slab = jax.block_until_ready(pack_params(params))   # one-time packing, outside the call path
    current = jax.random.normal(k_in, (BATCH, ITEM_NUM * ITEM_SIZE), jnp.float32)

    out = simulator_forward(current, slab)
    out = jax.block_until_ready(out)

    ref = reference_forward(current, params)
    assert out.shape == (BATCH, N_OUTPUT), out.shape
    assert jnp.allclose(out, ref, atol=1e-5, rtol=1e-5), float(jnp.max(jnp.abs(out - ref)))

    print("KERNEL_OK")
</pallas_src>

<mosaic_0001>
module attributes {stable_mosaic.version = 11 : i64} {
  func.func @_simulator_kernel(%arg0: memref<16x32xf32, #tpu.memory_space<vmem>>, %arg1: memref<448x128xf32, #tpu.memory_space<vmem>>, %arg2: memref<16x128xf32, #tpu.memory_space<vmem>>) attributes {dimension_semantics = [], scalar_prefetch = 0 : i64, scratch_operands = 0 : i64, tpu.core_type = #tpu.core_type<tc>} {
    %c0 = arith.constant 0 : index
    %c0_0 = arith.constant 0 : index
    %0 = vector.load %arg0[%c0, %c0_0] : memref<16x32xf32, #tpu.memory_space<vmem>>, vector<16x32xf32>
    %c0_1 = arith.constant 0 : index
    %c0_2 = arith.constant 0 : index
    %1 = vector.load %arg1[%c0_1, %c0_2] : memref<448x128xf32, #tpu.memory_space<vmem>>, vector<32x128xf32>
    %c32 = arith.constant 32 : index
    %c0_3 = arith.constant 0 : index
    %2 = vector.load %arg1[%c32, %c0_3] : memref<448x128xf32, #tpu.memory_space<vmem>>, vector<128x128xf32>
    %c160 = arith.constant 160 : index
    %c0_4 = arith.constant 0 : index
    %3 = vector.load %arg1[%c160, %c0_4] : memref<448x128xf32, #tpu.memory_space<vmem>>, vector<128x128xf32>
    %c288 = arith.constant 288 : index
    %c0_5 = arith.constant 0 : index
    %4 = vector.load %arg1[%c288, %c0_5] : memref<448x128xf32, #tpu.memory_space<vmem>>, vector<128x128xf32>
    %c416 = arith.constant 416 : index
    %c0_6 = arith.constant 0 : index
    %5 = vector.load %arg1[%c416, %c0_6] : memref<448x128xf32, #tpu.memory_space<vmem>>, vector<1x128xf32>
    %c424 = arith.constant 424 : index
    %c0_7 = arith.constant 0 : index
    %6 = vector.load %arg1[%c424, %c0_7] : memref<448x128xf32, #tpu.memory_space<vmem>>, vector<1x128xf32>
    %c432 = arith.constant 432 : index
    %c0_8 = arith.constant 0 : index
    %7 = vector.load %arg1[%c432, %c0_8] : memref<448x128xf32, #tpu.memory_space<vmem>>, vector<1x128xf32>
    %c440 = arith.constant 440 : index
    %c0_9 = arith.constant 0 : index
    %8 = vector.load %arg1[%c440, %c0_9] : memref<448x128xf32, #tpu.memory_space<vmem>>, vector<1x128xf32>
    %cst = arith.constant dense<0.000000e+00> : vector<16x128xf32>
    %9 = tpu.matmul %0, %1, %cst {dimension_numbers = #tpu.dot_dimension_numbers<[1], [0], [0], [1], [0, 0, 1, 1], [], []>} : vector<16x32xf32>, vector<32x128xf32>, vector<16x128xf32> -> vector<16x128xf32>
    %10 = vector.broadcast %5 : vector<1x128xf32> to vector<16x128xf32>
    %11 = arith.addf %9, %10 : vector<16x128xf32>
    %12 = math.tanh %11 : vector<16x128xf32>
    %cst_10 = arith.constant dense<0.000000e+00> : vector<16x128xf32>
    %13 = tpu.matmul %12, %2, %cst_10 {dimension_numbers = #tpu.dot_dimension_numbers<[1], [0], [0], [1], [0, 0, 1, 1], [], []>} : vector<16x128xf32>, vector<128x128xf32>, vector<16x128xf32> -> vector<16x128xf32>
    %14 = vector.broadcast %6 : vector<1x128xf32> to vector<16x128xf32>
    %15 = arith.addf %13, %14 : vector<16x128xf32>
    %cst_11 = arith.constant 0.000000e+00 : f32
    %16 = vector.broadcast %cst_11 : f32 to vector<16x128xf32>
    %17 = arith.maximumf %15, %16 : vector<16x128xf32>
    %cst_12 = arith.constant dense<0.000000e+00> : vector<16x128xf32>
    %18 = tpu.matmul %17, %3, %cst_12 {dimension_numbers = #tpu.dot_dimension_numbers<[1], [0], [0], [1], [0, 0, 1, 1], [], []>} : vector<16x128xf32>, vector<128x128xf32>, vector<16x128xf32> -> vector<16x128xf32>
    %19 = vector.broadcast %7 : vector<1x128xf32> to vector<16x128xf32>
    %20 = arith.addf %18, %19 : vector<16x128xf32>
    %cst_13 = arith.constant 0.000000e+00 : f32
    %21 = vector.broadcast %cst_13 : f32 to vector<16x128xf32>
    %22 = arith.maximumf %20, %21 : vector<16x128xf32>
    %cst_14 = arith.constant dense<0.000000e+00> : vector<16x128xf32>
    %23 = tpu.matmul %22, %4, %cst_14 {dimension_numbers = #tpu.dot_dimension_numbers<[1], [0], [0], [1], [0, 0, 1, 1], [], []>} : vector<16x128xf32>, vector<128x128xf32>, vector<16x128xf32> -> vector<16x128xf32>
    %24 = vector.broadcast %8 : vector<1x128xf32> to vector<16x128xf32>
    %25 = arith.addf %23, %24 : vector<16x128xf32>
    %c0_15 = arith.constant 0 : index
    %c0_16 = arith.constant 0 : index
    %26 = vector.load %arg2[%c0_15, %c0_16] : memref<16x128xf32, #tpu.memory_space<vmem>>, vector<16x128xf32>
    tpu.vector_store %arg2[%c0_15, %c0_16], %25 {strides = array<i32>} : memref<16x128xf32, #tpu.memory_space<vmem>>, vector<16x128xf32>,
    return
  }
}

</mosaic_0001>

<bundles_post_ra>
// kernel: simulator_forward.1
= control target key start
LH: loop header
LB: loop body
LE: loop exit
PB: predicated region body
PF: predicated region fallthrough
CT: control target
= control target key end

     0   :  { %7 = vsyncpa [#allocation3], 0  ;;  %s744_s0 = inlined_call_operand.hbm [shape: f32[16,32], index: 0, kind: input, shape index: {}]   ;;  %s745_s1 = inlined_call_operand.hbm [shape: f32[448,128], index: 1, kind: input, shape index: {}]   ;;  %s746_s2 = inlined_call_operand.hbm [shape: f32[16,128], index: 2, kind: output, shape index: {}]  }
   0x1   :  { %8 = vsyncpa [#allocation6], 0 }
   0x2   :  { %9 = vsyncpa [#allocation4], 0  ;;  %s704_s9 = smov [#allocation2]  }
   0x3   :  { %s15_s10 = sshll.u32 %s704_s9, 4  ;;  %s16_s10 = int_to_ptr.vmem [resolvable:$true] %s15_s10 }
   0x4   :  { %s646_s11 = scalar_lea.vmem %s16_s10, 256  ;;  %p651_p1 = scmp.lt.s32.totalorder %s16_s10, %s16_s10 }
   0x5   :  { %p647_p0 = scmp.ne.s32.totalorder %s16_s10, %s646_s11  ;;  %p652_p2 = scmp.lt.s32.totalorder %s646_s11, %s646_s11 }
   0x7   :  { %p653_p3 = por %p652_p2, %p651_p1 }
   0x9   :  { %p654_p4 = pnand %p653_p3, %p647_p0 }
   0xb   :  { %657 = shalt.err (!%p654_p4)
}
   0xc   :  { %s705_s12 = smov 128   ;;  %s706_s13 = smov 8  }
   0xd   :  { %21 = dma.hbm_to_vmem [thread:$0]  %s744_s0, 256, %s16_s10, [#allocation3], %s705_s12, %s705_s12, %s706_s13  }
   0xe   :  { %s707_s16 = smov [#allocation5]  }
   0xf   :  { %s27_s17 = sshll.u32 %s707_s16, 4  ;;  %s28_s17 = int_to_ptr.vmem [resolvable:$true] %s27_s17 }
  0x10   :  { %s666_s18 = scalar_lea.vmem %s28_s17, 7168  ;;  %p671_p6 = scmp.lt.s32.totalorder %s28_s17, %s28_s17 }
  0x11   :  { %p667_p5 = scmp.ne.s32.totalorder %s28_s17, %s666_s18  ;;  %p672_p7 = scmp.lt.s32.totalorder %s666_s18, %s666_s18 }
  0x13   :  { %p673_p8 = por %p672_p7, %p671_p6 }
  0x15   :  { %p674_p9 = pnand %p673_p8, %p667_p5 }
  0x17   :  { %677 = shalt.err (!%p674_p9)
}
  0x18   :  { %33 = dma.hbm_to_vmem [thread:$0]  %s745_s1, 7168, %s28_s17, [#allocation6], %s705_s12, %s705_s12, %s706_s13  }
  0x19   :  { %698 = dma.done.wait [#allocation3], 256  }
  0x1a   :  { %699 = vsyncadd [#allocation3], 4294967040 }
  0x1b   :  { %700 = dma.done.wait [#allocation6], 7168  }
  0x1c   :  { %701 = vsyncadd [#allocation6], 4294960128  ;;  %vm102_vm0 = vcmask 261120   ;;  %v45_v0 = vld [vmem:[#allocation5 + $0x18] sm:$0xff]  ;;  %v44_v1 = vld [vmem:[#allocation5 + $0x10] sm:$0xff]  ;;  %s708_s0 = smov [#allocation7]  }
  0x1d   :  { %513 = vmatprep.subr.mxu0 %v45_v0  ;;  %v40_v2 = vld [vmem:[#allocation2] sm:$0xff]  ;;  %v43_v3 = vld [vmem:[#allocation5 + $0x8] sm:$0xff]  ;;  %v61_v4 = vld [vmem:[#allocation5 + $0x98] sm:$0xff]  ;;  %s434_s1 = sshll.u32 %s708_s0, 4  ;;  %s435_s1 = int_to_ptr.vmem [resolvable:$true] %s434_s1 }
  0x1e   :  { %514 = vmatpush3.msra.mxu0 %v45_v0  ;;  %521 = vmatprep.mubr.msk.f32.mxu0 %vm102_vm0, %v40_v2  ;;  %v60_v5 = vld [vmem:[#allocation5 + $0x90] sm:$0xff]  ;;  %v42_v6 = vld [vmem:[#allocation5] sm:$0xff]  ;;  %v59_v7 = vld [vmem:[#allocation5 + $0x88] sm:$0xff]  ;;  %s678_s21 = scalar_lea.vmem %s435_s1, 256  ;;  %p683_p11 = scmp.lt.s32.totalorder %s435_s1, %s435_s1 }
  0x1f   :  { %515 = vmatprep.subr.mxu0 %v44_v1  ;;  %524 = vmatprep.subr.mxu1 %v61_v4  ;;  %v41_v8 = vld [vmem:[#allocation2 + $0x8] sm:$0xff]  ;;  %v58_v9 = vld [vmem:[#allocation5 + $0x80] sm:$0xff]  ;;  %v56_v11 = vld [vmem:[#allocation5 + $0x70] sm:$0xff]  ;;  %p679_p10 = scmp.ne.s32.totalorder %s435_s1, %s678_s21  ;;  %p684_p12 = scmp.lt.s32.totalorder %s678_s21, %s678_s21 }
  0x20   :  { %516 = vmatpush3.msra.mxu0 %v44_v1  ;;  %525 = vmatpush3.msra.mxu1 %v61_v4  ;;  %v57_v10 = vld [vmem:[#allocation5 + $0x78] sm:$0xff]  ;;  %v55_v12 = vld [vmem:[#allocation5 + $0x68] sm:$0xff]  ;;  %v54_v13 = vld [vmem:[#allocation5 + $0x60] sm:$0xff] }
  0x21   :  { %517 = vmatprep.subr.mxu0 %v43_v3  ;;  %526 = vmatprep.subr.mxu1 %v60_v5  ;;  %v53_v14 = vld [vmem:[#allocation5 + $0x58] sm:$0xff]  ;;  %v52_v15 = vld [vmem:[#allocation5 + $0x50] sm:$0xff]  ;;  %v51_v16 = vld [vmem:[#allocation5 + $0x48] sm:$0xff]  ;;  %p685_p13 = por %p684_p12, %p683_p11 }
  0x22   :  { %518 = vmatpush3.msra.mxu0 %v43_v3  ;;  %527 = vmatpush3.msra.mxu1 %v60_v5  ;;  %v50_v17 = vld [vmem:[#allocation5 + $0x40] sm:$0xff]  ;;  %v49_v18 = vld [vmem:[#allocation5 + $0x38] sm:$0xff]  ;;  %v48_v19 = vld [vmem:[#allocation5 + $0x30] sm:$0xff] }
  0x23   :  { %519 = vmatprep.subr.mxu0 %v42_v6  ;;  %528 = vmatprep.subr.mxu1 %v59_v7  ;;  %v47_v20 = vld [vmem:[#allocation5 + $0x28] sm:$0xff]  ;;  %v46_v21 = vld [vmem:[#allocation5 + $0x20] sm:$0xff]  ;;  %v77_v22 = vld [vmem:[#allocation5 + $0x118] sm:$0xff]  ;;  %p686_p0 = pnand %p685_p13, %p679_p10 }
  0x24   :  { %520 = vmatpush3.msra.mxu0 %v42_v6  ;;  %529 = vmatpush3.msra.mxu1 %v59_v7  ;;  %v76_v23 = vld [vmem:[#allocation5 + $0x110] sm:$0xff]  ;;  %v75_v24 = vld [vmem:[#allocation5 + $0x108] sm:$0xff]  ;;  %v74_v25 = vld [vmem:[#allocation5 + $0x100] sm:$0xff] }
  0x25   :  { %522 = vmatmul.mubr.msk.f32.vlgmr.msra.gmra.mxu0 %vm102_vm0, %v41_v8  ;;  %530 = vmatprep.subr.mxu1 %v58_v9  ;;  %v73_v26 = vld [vmem:[#allocation5 + $0xf8] sm:$0xff]  ;;  %v72_v27 = vld [vmem:[#allocation5 + $0xf0] sm:$0xff]  ;;  %v71_v28 = vld [vmem:[#allocation5 + $0xe8] sm:$0xff] }
  0x26   :  { %531 = vmatpush3.msra.mxu1 %v58_v9  ;;  %559 = vmatprep.subr.mxu0 %v77_v22  ;;  %v70_v29 = vld [vmem:[#allocation5 + $0xe0] sm:$0xff]  ;;  %v69_v30 = vld [vmem:[#allocation5 + $0xd8] sm:$0xff]  ;;  %v68_v31 = vld [vmem:[#allocation5 + $0xd0] sm:$0xff] }
  0x27   :  { %532 = vmatprep.subr.mxu1 %v57_v10  ;;  %560 = vmatpush3.msra.mxu0 %v77_v22  ;;  %v67_v32 = vld [vmem:[#allocation5 + $0xc8] sm:$0xff]  ;;  %v66_v33 = vld [vmem:[#allocation5 + $0xc0] sm:$0xff]  ;;  %v65_v41 = vld [vmem:[#allocation5 + $0xb8] sm:$0xff] }
  0x28   :  { %533 = vmatpush3.msra.mxu1 %v57_v10  ;;  %561 = vmatprep.subr.mxu0 %v76_v23  ;;  %v447_v34 = vld [vmem:[#allocation5 + $0x1a0] ss:$0 sm:$0xff]  ;;  %v64_v42 = vld [vmem:[#allocation5 + $0xb0] sm:$0xff]  ;;  %v63_v43 = vld [vmem:[#allocation5 + $0xa8] sm:$0xff] }
  0x29   :  { %534 = vmatprep.subr.mxu1 %v56_v11  ;;  %562 = vmatpush3.msra.mxu0 %v76_v23  ;;  %v62_v44 = vld [vmem:[#allocation5 + $0xa0] sm:$0xff]  ;;  %v93_v45 = vld [vmem:[#allocation5 + $0x198] sm:$0xff]  ;;  %v92_v46 = vld [vmem:[#allocation5 + $0x190] sm:$0xff] }
  0x2a   :  { %535 = vmatpush3.msra.mxu1 %v56_v11  ;;  %563 = vmatprep.subr.mxu0 %v75_v24  ;;  %v91_v47 = vld [vmem:[#allocation5 + $0x188] sm:$0xff]  ;;  %v90_v48 = vld [vmem:[#allocation5 + $0x180] sm:$0xff]  ;;  %v89_v49 = vld [vmem:[#allocation5 + $0x178] sm:$0xff] }
  0x2b   :  { %536 = vmatprep.subr.mxu1 %v55_v12  ;;  %564 = vmatpush3.msra.mxu0 %v75_v24  ;;  %v88_v50 = vld [vmem:[#allocation5 + $0x170] sm:$0xff]  ;;  %v87_v51 = vld [vmem:[#allocation5 + $0x168] sm:$0xff]  ;;  %v86_v52 = vld [vmem:[#allocation5 + $0x160] sm:$0xff] }
  0x2c   :  { %537 = vmatpush3.msra.mxu1 %v55_v12  ;;  %565 = vmatprep.subr.mxu0 %v74_v25  ;;  %v85_v53 = vld [vmem:[#allocation5 + $0x158] sm:$0xff]  ;;  %v84_v54 = vld [vmem:[#allocation5 + $0x150] sm:$0xff]  ;;  %v83_v55 = vld [vmem:[#allocation5 + $0x148] sm:$0xff] }
  0x2d   :  { %538 = vmatprep.subr.mxu1 %v54_v13  ;;  %566 = vmatpush3.msra.mxu0 %v74_v25  ;;  %v82_v56 = vld [vmem:[#allocation5 + $0x140] sm:$0xff]  ;;  %v450_v57 = vld [vmem:[#allocation5 + $0x1a8] ss:$0 sm:$0xff]  ;;  %v81_v0 = vld [vmem:[#allocation5 + $0x138] sm:$0xff] }
  0x2e   :  { %539 = vmatpush3.msra.mxu1 %v54_v13  ;;  %567 = vmatprep.subr.mxu0 %v73_v26  ;;  %v80_v1 = vld [vmem:[#allocation5 + $0x130] sm:$0xff]  ;;  %v79_v2 = vld [vmem:[#allocation5 + $0x128] sm:$0xff]  ;;  %v78_v3 = vld [vmem:[#allocation5 + $0x120] sm:$0xff] }
  0x2f   :  { %540 = vmatprep.subr.mxu1 %v53_v14  ;;  %568 = vmatpush3.msra.mxu0 %v73_v26  ;;  %v451_v4 = vld [vmem:[#allocation5 + $0x1b0] ss:$0 sm:$0xff]  ;;  %v452_v11 = vld [vmem:[#allocation5 + $0x1b8] ss:$0 sm:$0xff] }
  0x30   :  { %541 = vmatpush3.msra.mxu1 %v53_v14  ;;  %569 = vmatprep.subr.mxu0 %v72_v27 }
  0x31   :  { %542 = vmatprep.subr.mxu1 %v52_v15  ;;  %570 = vmatpush3.msra.mxu0 %v72_v27 }
  0x32   :  { %543 = vmatpush3.msra.mxu1 %v52_v15  ;;  %571 = vmatprep.subr.mxu0 %v71_v28 }
  0x33   :  { %544 = vmatprep.subr.mxu1 %v51_v16  ;;  %572 = vmatpush3.msra.mxu0 %v71_v28 }
  0x34   :  { %545 = vmatpush3.msra.mxu1 %v51_v16  ;;  %573 = vmatprep.subr.mxu0 %v70_v29 }
  0x35   :  { %546 = vmatprep.subr.mxu1 %v50_v17  ;;  %574 = vmatpush3.msra.mxu0 %v70_v29 }
  0x36   :  { %547 = vmatpush3.msra.mxu1 %v50_v17  ;;  %575 = vmatprep.subr.mxu0 %v69_v30 }
  0x37   :  { %548 = vmatprep.subr.mxu1 %v49_v18  ;;  %576 = vmatpush3.msra.mxu0 %v69_v30 }
  0x38   :  { %549 = vmatpush3.msra.mxu1 %v49_v18  ;;  %577 = vmatprep.subr.mxu0 %v68_v31 }
  0x39   :  { %550 = vmatprep.subr.mxu1 %v48_v19  ;;  %578 = vmatpush3.msra.mxu0 %v68_v31 }
  0x3a   :  { %551 = vmatpush3.msra.mxu1 %v48_v19  ;;  %579 = vmatprep.subr.mxu0 %v67_v32 }
  0x3b   :  { %552 = vmatprep.subr.mxu1 %v47_v20  ;;  %580 = vmatpush3.msra.mxu0 %v67_v32 }
  0x3c   :  { %553 = vmatpush3.msra.mxu1 %v47_v20  ;;  %581 = vmatprep.subr.mxu0 %v66_v33 }
  0x3d   :  { %554 = vmatprep.subr.mxu1 %v46_v21  ;;  %582 = vmatpush3.msra.mxu0 %v66_v33 }
  0x3e   :  { %555 = vmatpush3.msra.mxu1 %v46_v21  ;;  %583 = vmatprep.subr.mxu0 %v65_v41 }
  0x3f   :  { %584 = vmatpush3.msra.mxu0 %v65_v41  ;;  %594 = vmatprep.subr.mxu1 %v93_v45 }
  0x40   :  { %585 = vmatprep.subr.mxu0 %v64_v42 }
  0x41   :  { %586 = vmatpush3.msra.mxu0 %v64_v42 }
  0x42   :  { %587 = vmatprep.subr.mxu0 %v63_v43 }
  0x43   :  { %588 = vmatpush3.msra.mxu0 %v63_v43 }
  0x44   :  { %589 = vmatprep.subr.mxu0 %v62_v44 }
  0x45   :  { %590 = vmatpush3.msra.mxu0 %v62_v44 }
  0xe5   :  { %v523_v35 = vpop.f32.mrf.mxu0 }
  0xe6   :  { %v181_v36 = vadd.f32 %v523_v35, %v447_v34 }
  0xe7   :  { %v175_v37 = vpop.f32.mrf.mxu0 }
  0xe8   :  { %v176_v38 = vadd.f32 %v447_v34, %v175_v37 }
  0xea   :  { %634 = vtanh.f32 %v176_v38 }
  0xeb   :  { %636 = vtanh.f32 %v181_v36 }
  0xf7   :  { %v635_v39 = vpop.eup %634 }
  0xf8   :  { %v637_v40 = vpop.eup %636  ;;  %556 = vmatprep.mubr.f32.mxu1 %v635_v39 }
  0xf9   :  { %557 = vmatmul.mubr.f32.vlgmr.msra.gmra.mxu1 %v637_v40 }
  0xfa   :  { %595 = vmatpush3.msra.mxu1 %v93_v45 }
  0xfb   :  { %596 = vmatprep.subr.mxu1 %v92_v46 }
  0xfc   :  { %597 = vmatpush3.msra.mxu1 %v92_v46 }
  0xfd   :  { %598 = vmatprep.subr.mxu1 %v91_v47 }
  0xfe   :  { %599 = vmatpush3.msra.mxu1 %v91_v47 }
  0xff   :  { %600 = vmatprep.subr.mxu1 %v90_v48 }
 0x100   :  { %601 = vmatpush3.msra.mxu1 %v90_v48 }
 0x101   :  { %602 = vmatprep.subr.mxu1 %v89_v49 }
 0x102   :  { %603 = vmatpush3.msra.mxu1 %v89_v49 }
 0x103   :  { %604 = vmatprep.subr.mxu1 %v88_v50 }
 0x104   :  { %605 = vmatpush3.msra.mxu1 %v88_v50 }
 0x105   :  { %606 = vmatprep.subr.mxu1 %v87_v51 }
 0x106   :  { %607 = vmatpush3.msra.mxu1 %v87_v51 }
 0x107   :  { %608 = vmatprep.subr.mxu1 %v86_v52 }
 0x108   :  { %609 = vmatpush3.msra.mxu1 %v86_v52 }
 0x109   :  { %610 = vmatprep.subr.mxu1 %v85_v53 }
 0x10a   :  { %611 = vmatpush3.msra.mxu1 %v85_v53 }
 0x10b   :  { %612 = vmatprep.subr.mxu1 %v84_v54 }
 0x10c   :  { %613 = vmatpush3.msra.mxu1 %v84_v54 }
 0x10d   :  { %614 = vmatprep.subr.mxu1 %v83_v55 }
 0x10e   :  { %615 = vmatpush3.msra.mxu1 %v83_v55 }
 0x10f   :  { %616 = vmatprep.subr.mxu1 %v82_v56 }
 0x110   :  { %617 = vmatpush3.msra.mxu1 %v82_v56 }
 0x111   :  { %618 = vmatprep.subr.mxu1 %v81_v0 }
 0x112   :  { %619 = vmatpush3.msra.mxu1 %v81_v0 }
 0x113   :  { %620 = vmatprep.subr.mxu1 %v80_v1 }
 0x114   :  { %621 = vmatpush3.msra.mxu1 %v80_v1 }
 0x115   :  { %622 = vmatprep.subr.mxu1 %v79_v2 }
 0x116   :  { %623 = vmatpush3.msra.mxu1 %v79_v2 }
 0x117   :  { %624 = vmatprep.subr.mxu1 %v78_v3 }
 0x118   :  { %625 = vmatpush3.msra.mxu1 %v78_v3 }
 0x1b9   :  { %v558_v58 = vpop.f32.mrf.mxu1 }
 0x1ba   :  { %v262_v59 = vadd.f32 %v558_v58, %v450_v57 }
 0x1bb   :  { %v256_v60 = vpop.f32.mrf.mxu1 }
 0x1bc   :  { %v257_v61 = vadd.f32 %v450_v57, %v256_v60  ;;  %v266_v63 = vmax.f32 %v262_v59, 0.0 }
 0x1be   :  { %v265_v62 = vmax.f32 %v257_v61, 0.0 }
 0x1c0   :  { %591 = vmatprep.mubr.f32.mxu0 %v265_v62 }
 0x1c1   :  { %592 = vmatmul.mubr.f32.vlgmr.msra.gmra.mxu0 %v266_v63 }
 0x281   :  { %v593_v5 = vpop.f32.mrf.mxu0 }
 0x282   :  { %v343_v6 = vadd.f32 %v593_v5, %v451_v4 }
 0x283   :  { %v337_v7 = vpop.f32.mrf.mxu0 }
 0x284   :  { %v338_v8 = vadd.f32 %v451_v4, %v337_v7  ;;  %v347_v10 = vmax.f32 %v343_v6, 0.0 }
 0x286   :  { %v346_v9 = vmax.f32 %v338_v8, 0.0 }
 0x288   :  { %626 = vmatprep.mubr.f32.mxu1 %v346_v9 }
 0x289   :  { %627 = vmatmul.mubr.f32.vlgmr.msra.gmra.mxu1 %v347_v10 }
 0x349   :  { %v628_v12 = vpop.f32.mrf.mxu1 }
 0x34a   :  { %v424_v13 = vadd.f32 %v628_v12, %v452_v11 }
 0x34b   :  { %v418_v14 = vpop.f32.mrf.mxu1 }
 0x34c   :  { %428 = vst [vmem:[#allocation7 + $0x8] sm:$0xff] %v424_v13  ;;  %v419_v15 = vadd.f32 %v452_v11, %v418_v14 }
 0x34e   :  { %427 = vst [vmem:[#allocation7] sm:$0xff] %v419_v15 }
 0x34f   :  { %689 = shalt.err (!%p686_p0)
}
 0x350   :  { %440 = dma.vmem_to_hbm [thread:$0]  %s435_s1, 256, %s746_s2, [#allocation4], %s705_s12, %s705_s12, %s706_s13  }
 0x351   :  { %702 = dma.done.wait [#allocation4], 256  }
 0x352   :  { %703 = vsyncadd [#allocation4], 4294967040 }
 0x353   :  { %444 = vsyncpa [#allocation3], 1 }
 0x354   :  { %445 = vsyncpa [#allocation6], 1 }
 0x355   :  { %446 = vsyncpa [#allocation4], 1 }

</bundles_post_ra>
